<compile_context>
chip_gen: v6e
topology: v6e:2x2x1
jax: 0.10.0
libtpu: 0.0.40
codegen_flags: <defaults>
</compile_context>

<pallas_src>
import functools

import jax
import jax.numpy as jnp
from jax.experimental import pallas as pl
from jax.experimental.pallas import tpu as pltpu


# ----------------------------- config ---------------------------------------
class Params:
    in_channels = 4
    num_filters = [8, 8, 16]
    kernel_sizes = [3, 3, 3]
    dilations = [1, 2, 4]
    skip_types = ["Res-connect", "Res-connect", "Res-connect"]
    dropout_rate = 0.1
    num_classes = 5


# ----------------------------- fused kernel ---------------------------------
def _bitcn_fused_kernel(*refs, B, L, layer_specs):
    # refs = (x, bn0_pos_s, bn0_pos_b, bn0_rev_s, bn0_rev_b,
    #         [w, bn_scale, bn_bias, (proj, proj_b)] per layer, head_w, head_b,
    #         o_ref, col_ref)
    col_ref = refs[-1]                      # VMEM im2col scratch (B*L, max K*2*Cin)
    o_ref = refs[-2]                        # (B, num_classes)
    rit = iter(refs[:-2])

    x_ref = next(rit)                       # (B*L, Cin0), time-major rows
    s0p, b0p, s0r, b0r = next(rit), next(rit), next(rit), next(rit)

    R = B * L
    x = x_ref[...]
    y_pos = x * s0p[...] + b0p[...]         # eval-mode BatchNorm1d (folded affine)
    y_rev = x * s0r[...] + b0r[...]

    def write_taps(v, lane0, width, cc, K, dil):
        # Scatter causally-shifted copies of v (R, width) into the im2col scratch:
        #   col[b*L + t, k*cc + lane0 + c] = v[b*L + t - (K-1-k)*dil, c], 0 when t < shift.
        # Only static-sliced VMEM stores -> cheap, stays on-chip.
        for k in range(K):
            s = (K - 1 - k) * dil
            base = k * cc + lane0
            for b in range(B):
                lo = b * L
                if s > 0:
                    col_ref[lo:lo + s, base:base + width] = jnp.zeros(
                        (s, width), jnp.float32)
                col_ref[lo + s:lo + L, base:base + width] = v[lo:lo + L - s, :]

    h = None
    for li, (K, dil, cin, cout, has_proj) in enumerate(layer_specs):
        cc = 2 * cin                        # combined (pos + rev) input channels
        if li == 0:
            write_taps(y_pos, 0, cin, cc, K, dil)
            write_taps(y_rev, cin, cin, cc, K, dil)
            # Tap K-1 has shift 0, so its band holds the unshifted [y_pos | y_rev];
            # reuse it as the residual-path input (no concatenate needed).
            prev = col_ref[:, (K - 1) * cc:(K - 1) * cc + cc]
        else:
            prev = h
            write_taps(h, 0, cc, cc, K, dil)

        w_ref, sc_ref, bi_ref = next(rit), next(rit), next(rit)
        # Single im2col matmul covering all K taps and BOTH directions at once.
        conv = jnp.dot(col_ref[:, :K * cc], w_ref[...],
                       preferred_element_type=jnp.float32)          # (R, 2*cout)
        # BN(eval) with conv bias folded in, then ReLU (Dropout = identity in eval).
        act = jnp.maximum(conv * sc_ref[...] + bi_ref[...], 0.0)
        if has_proj:                        # 1x1-conv residual projection (block-diag)
            p_ref, q_ref = next(rit), next(rit)
            res = jnp.dot(prev, p_ref[...],
                          preferred_element_type=jnp.float32) + q_ref[...]
        else:                               # identity residual: no matmul at all
            res = prev
        h = act + res                       # (R, 2*cout)

    # AdaptiveAvgPool1d(1) over time + concat(pos, rev) + Linear -> two tiny matmuls.
    wh_ref, bh_ref = next(rit), next(rit)
    rb = jax.lax.broadcasted_iota(jnp.int32, (B, R), 0)
    cb = jax.lax.broadcasted_iota(jnp.int32, (B, R), 1)
    pool = jnp.where((cb >= rb * L) & (cb < (rb + 1) * L),
                     1.0 / L, 0.0).astype(jnp.float32)               # (B, B*L)
    pooled = jnp.dot(pool, h, preferred_element_type=jnp.float32)    # (B, 2*C_last)
    o_ref[...] = (jnp.dot(pooled, wh_ref[...],
                          preferred_element_type=jnp.float32)
                  + bh_ref[...]).astype(o_ref.dtype)


def bitcn_forward(x, fused_args, layer_specs, cfg):
    """x: (B, 1, C_in, L) as in PyTorch.  The two torch.flip calls on the reverse path
    cancel, so no flip is performed.  The only host-side layout op is one tiny NCL ->
    time-major transform of the raw input; everything else runs inside one kernel with
    all activations resident in VMEM."""
    B, _, Cin, L = x.shape
    x2 = jnp.transpose(x.reshape(B, Cin, L), (0, 2, 1)).reshape(B * L, Cin)
    col_w = max(K * 2 * cin for (K, _, cin, _, _) in layer_specs)
    kernel = functools.partial(_bitcn_fused_kernel, B=B, L=L, layer_specs=layer_specs)
    return pl.pallas_call(
        kernel,
        out_shape=jax.ShapeDtypeStruct((B, cfg.num_classes), jnp.float32),
        scratch_shapes=[pltpu.VMEM((B * L, col_w), jnp.float32)],
    )(x2, *fused_args)
    # NOTE: on v7x one could additionally split pos/rev over the two TensorCores with a
    # size-2 "parallel" grid axis; at this problem size the single launch dominates.


# ------------------------- parameter construction ---------------------------
def _bn_affine(key, c):
    k1, k2, k3, k4 = jax.random.split(key, 4)
    gamma = 1.0 + 0.1 * jax.random.normal(k1, (c,))
    beta = 0.1 * jax.random.normal(k2, (c,))
    mean = 0.1 * jax.random.normal(k3, (c,))
    var = 1.0 + 0.1 * jax.random.uniform(k4, (c,))
    eps = 1e-5
    scale = gamma / jnp.sqrt(var + eps)
    bias = beta - mean * scale
    return (scale.reshape(1, c).astype(jnp.float32),
            bias.reshape(1, c).astype(jnp.float32))


def _init_block(key, cin, cout, K):
    ks = jax.random.split(key, 6)
    # weight_norm(Conv1d): W = g * v / ||v||  (norm over (in, k) per out-channel)
    v = 0.3 * jax.random.normal(ks[0], (cout, cin, K))
    g = jnp.abs(1.0 + 0.1 * jax.random.normal(ks[1], (cout,)))
    norm = jnp.sqrt(jnp.sum(v * v, axis=(1, 2), keepdims=True))
    W = (g.reshape(cout, 1, 1) / norm) * v
    w_taps = jnp.transpose(W, (2, 1, 0)).astype(jnp.float32)      # (K, Cin, Cout)
    conv_b = (0.1 * jax.random.normal(ks[2], (1, cout))).astype(jnp.float32)
    bn_scale, bn_bias = _bn_affine(ks[3], cout)
    if cin != cout:  # Res-connect with 1x1 conv projection
        skip_w = (0.3 * jax.random.normal(ks[4], (cin, cout))).astype(jnp.float32)
        skip_b = (0.1 * jax.random.normal(ks[5], (1, cout))).astype(jnp.float32)
    else:            # identity residual
        skip_w, skip_b = None, None
    return dict(w=w_taps, b=conv_b, bn_scale=bn_scale, bn_bias=bn_bias,
                skip_w=skip_w, skip_b=skip_b)


def _init_tcn(key, cfg):
    n = len(cfg.num_filters)
    keys = jax.random.split(key, n + 1)
    bn0_scale, bn0_bias = _bn_affine(keys[0], cfg.in_channels)
    blocks, cin = [], cfg.in_channels
    for i in range(n):
        blocks.append(_init_block(keys[i + 1], cin, cfg.num_filters[i],
                                  cfg.kernel_sizes[i]))
        cin = cfg.num_filters[i]
    return dict(bn0_scale=bn0_scale, bn0_bias=bn0_bias, blocks=blocks)


def init_bitcn(key, cfg):
    k1, k2, k3, k4 = jax.random.split(key, 4)
    c_last = cfg.num_filters[-1]
    W = 0.2 * jax.random.normal(k3, (cfg.num_classes, 2 * c_last))   # Linear weight
    b = 0.1 * jax.random.normal(k4, (1, cfg.num_classes))
    return dict(pos=_init_tcn(k1, cfg), rev=_init_tcn(k2, cfg),
                head_w=jnp.transpose(W).astype(jnp.float32),         # (2*C_last, ncls)
                head_b=b.astype(jnp.float32))


def fuse_params(params, cfg):
    """One-time layout plumbing: stitch the two directions into block-structured
    weights (one matmul per layer covers pos+rev) and fold the conv bias into the
    eval-BN affine."""
    pos, rev = params["pos"], params["rev"]
    args = [pos["bn0_scale"], pos["bn0_bias"], rev["bn0_scale"], rev["bn0_bias"]]
    layer_specs = []
    cins = [cfg.in_channels] + list(cfg.num_filters[:-1])
    for i, (bp, br) in enumerate(zip(pos["blocks"], rev["blocks"])):
        K, dil = cfg.kernel_sizes[i], cfg.dilations[i]
        cin, cout = cins[i], cfg.num_filters[i]
        W = jnp.zeros((K, 2 * cin, 2 * cout), jnp.float32)
        W = W.at[:, :cin, :cout].set(bp["w"]).at[:, cin:, cout:].set(br["w"])
        scale = jnp.concatenate([bp["bn_scale"], br["bn_scale"]], axis=1)
        bias = jnp.concatenate([bp["b"] * bp["bn_scale"] + bp["bn_bias"],
                                br["b"] * br["bn_scale"] + br["bn_bias"]], axis=1)
        args += [W.reshape(K * 2 * cin, 2 * cout), scale, bias]
        has_proj = bp["skip_w"] is not None
        if has_proj:
            P = jnp.zeros((2 * cin, 2 * cout), jnp.float32)
            P = P.at[:cin, :cout].set(bp["skip_w"]).at[cin:, cout:].set(br["skip_w"])
            Q = jnp.concatenate([bp["skip_b"], br["skip_b"]], axis=1)
            args += [P, Q]
        layer_specs.append((K, dil, cin, cout, has_proj))
    args += [params["head_w"], params["head_b"]]
    return args, tuple(layer_specs)


# --------------------------- pure-JAX reference ------------------------------
def _ref_tcn(x_blc, tp, cfg):
    hp = jax.lax.Precision.HIGHEST
    y = x_blc * tp["bn0_scale"][None] + tp["bn0_bias"][None]
    for i, blk in enumerate(tp["blocks"]):
        K, dil = cfg.kernel_sizes[i], cfg.dilations[i]
        pad = (K - 1) * dil
        L = y.shape[1]
        yp = jnp.pad(y, ((0, 0), (pad, 0), (0, 0)))
        acc = jnp.zeros(y.shape[:2] + (blk["w"].shape[2],), jnp.float32) + blk["b"][None]
        for k in range(K):
            acc = acc + jnp.einsum("blc,co->blo", yp[:, k * dil:k * dil + L, :],
                                   blk["w"][k], precision=hp)
        out = jnp.maximum(acc * blk["bn_scale"][None] + blk["bn_bias"][None], 0.0)
        if blk["skip_w"] is not None:
            res = jnp.einsum("blc,co->blo", y, blk["skip_w"],
                             precision=hp) + blk["skip_b"][None]
        else:
            res = y
        y = out + res
    return jnp.mean(y, axis=1)


def bitcn_reference(x, params, cfg):
    B, _, Cin, L = x.shape
    xt = jnp.transpose(x.reshape(B, Cin, L), (0, 2, 1))
    # torch.flip(x, dims=[3]) followed by torch.flip(dims=[2]) inside TCN(reverse=True)
    # cancel out, so both TCNs see the original time order (with their own weights).
    feat = jnp.concatenate([_ref_tcn(xt, params["pos"], cfg),
                            _ref_tcn(xt, params["rev"], cfg)], axis=1)
    return jnp.dot(feat, params["head_w"],
                   precision=jax.lax.Precision.HIGHEST) + params["head_b"]


# ------------------------------- main ----------------------------------------
if __name__ == "__main__":
    cfg = Params()
    B, L = 2, 16
    key = jax.random.PRNGKey(0)
    kx, kp = jax.random.split(key)
    x = jax.random.normal(kx, (B, 1, cfg.in_channels, L), dtype=jnp.float32)

    params = init_bitcn(kp, cfg)
    fused_args, layer_specs = fuse_params(params, cfg)

    out = bitcn_forward(x, fused_args, layer_specs, cfg)
    out = jax.block_until_ready(out)

    assert out.shape == (B, cfg.num_classes)
    assert bool(jnp.all(jnp.isfinite(out)))

    ref = bitcn_reference(x, params, cfg)
    err = float(jnp.max(jnp.abs(out - ref)))
    assert err < 2e-3, f"kernel/reference mismatch: max abs err {err}"

    print("KERNEL_OK")
</pallas_src>

<mosaic_0001>
module attributes {stable_mosaic.version = 11 : i64} {
  func.func @_bitcn_fused_kernel(%arg0: memref<32x4xf32, #tpu.memory_space<vmem>>, %arg1: memref<1x4xf32, #tpu.memory_space<vmem>>, %arg2: memref<1x4xf32, #tpu.memory_space<vmem>>, %arg3: memref<1x4xf32, #tpu.memory_space<vmem>>, %arg4: memref<1x4xf32, #tpu.memory_space<vmem>>, %arg5: memref<24x16xf32, #tpu.memory_space<vmem>>, %arg6: memref<1x16xf32, #tpu.memory_space<vmem>>, %arg7: memref<1x16xf32, #tpu.memory_space<vmem>>, %arg8: memref<8x16xf32, #tpu.memory_space<vmem>>, %arg9: memref<1x16xf32, #tpu.memory_space<vmem>>, %arg10: memref<48x16xf32, #tpu.memory_space<vmem>>, %arg11: memref<1x16xf32, #tpu.memory_space<vmem>>, %arg12: memref<1x16xf32, #tpu.memory_space<vmem>>, %arg13: memref<48x32xf32, #tpu.memory_space<vmem>>, %arg14: memref<1x32xf32, #tpu.memory_space<vmem>>, %arg15: memref<1x32xf32, #tpu.memory_space<vmem>>, %arg16: memref<16x32xf32, #tpu.memory_space<vmem>>, %arg17: memref<1x32xf32, #tpu.memory_space<vmem>>, %arg18: memref<32x5xf32, #tpu.memory_space<vmem>>, %arg19: memref<1x5xf32, #tpu.memory_space<vmem>>, %arg20: memref<2x5xf32, #tpu.memory_space<vmem>>, %arg21: memref<32x48xf32, #tpu.memory_space<vmem>>) attributes {dimension_semantics = [], scalar_prefetch = 0 : i64, scratch_operands = 1 : i64, tpu.core_type = #tpu.core_type<tc>} {
    %c0 = arith.constant 0 : index
    %c0_0 = arith.constant 0 : index
    %0 = vector.load %arg0[%c0, %c0_0] : memref<32x4xf32, #tpu.memory_space<vmem>>, vector<32x4xf32>
    %c0_1 = arith.constant 0 : index
    %c0_2 = arith.constant 0 : index
    %1 = vector.load %arg1[%c0_1, %c0_2] : memref<1x4xf32, #tpu.memory_space<vmem>>, vector<1x4xf32>
    %2 = vector.broadcast %1 : vector<1x4xf32> to vector<32x4xf32>
    %3 = arith.mulf %0, %2 : vector<32x4xf32>
    %c0_3 = arith.constant 0 : index
    %c0_4 = arith.constant 0 : index
    %4 = vector.load %arg2[%c0_3, %c0_4] : memref<1x4xf32, #tpu.memory_space<vmem>>, vector<1x4xf32>
    %5 = vector.broadcast %4 : vector<1x4xf32> to vector<32x4xf32>
    %6 = arith.addf %3, %5 : vector<32x4xf32>
    %c0_5 = arith.constant 0 : index
    %c0_6 = arith.constant 0 : index
    %7 = vector.load %arg3[%c0_5, %c0_6] : memref<1x4xf32, #tpu.memory_space<vmem>>, vector<1x4xf32>
    %8 = vector.broadcast %7 : vector<1x4xf32> to vector<32x4xf32>
    %9 = arith.mulf %0, %8 : vector<32x4xf32>
    %c0_7 = arith.constant 0 : index
    %c0_8 = arith.constant 0 : index
    %10 = vector.load %arg4[%c0_7, %c0_8] : memref<1x4xf32, #tpu.memory_space<vmem>>, vector<1x4xf32>
    %11 = vector.broadcast %10 : vector<1x4xf32> to vector<32x4xf32>
    %12 = arith.addf %9, %11 : vector<32x4xf32>
    %cst = arith.constant 0.000000e+00 : f32
    %13 = vector.broadcast %cst : f32 to vector<2x4xf32>
    %c0_9 = arith.constant 0 : index
    %c0_10 = arith.constant 0 : index
    %14 = vector.load %arg21[%c0_9, %c0_10] : memref<32x48xf32, #tpu.memory_space<vmem>>, vector<2x4xf32>
    tpu.vector_store %arg21[%c0_9, %c0_10], %13 {strides = array<i32>} : memref<32x48xf32, #tpu.memory_space<vmem>>, vector<2x4xf32>,
    %15 = vector.extract_strided_slice %6 {offsets = [0, 0], sizes = [14, 4], strides = [1, 1]} : vector<32x4xf32> to vector<14x4xf32>
    %c2 = arith.constant 2 : index
    %c0_11 = arith.constant 0 : index
    %16 = vector.load %arg21[%c2, %c0_11] : memref<32x48xf32, #tpu.memory_space<vmem>>, vector<14x4xf32>
    tpu.vector_store %arg21[%c2, %c0_11], %15 {strides = array<i32>} : memref<32x48xf32, #tpu.memory_space<vmem>>, vector<14x4xf32>,
    %cst_12 = arith.constant 0.000000e+00 : f32
    %17 = vector.broadcast %cst_12 : f32 to vector<2x4xf32>
    %c16 = arith.constant 16 : index
    %c0_13 = arith.constant 0 : index
    %18 = vector.load %arg21[%c16, %c0_13] : memref<32x48xf32, #tpu.memory_space<vmem>>, vector<2x4xf32>
    tpu.vector_store %arg21[%c16, %c0_13], %17 {strides = array<i32>} : memref<32x48xf32, #tpu.memory_space<vmem>>, vector<2x4xf32>,
    %19 = vector.extract_strided_slice %6 {offsets = [16, 0], sizes = [14, 4], strides = [1, 1]} : vector<32x4xf32> to vector<14x4xf32>
    %c18 = arith.constant 18 : index
    %c0_14 = arith.constant 0 : index
    %20 = vector.load %arg21[%c18, %c0_14] : memref<32x48xf32, #tpu.memory_space<vmem>>, vector<14x4xf32>
    tpu.vector_store %arg21[%c18, %c0_14], %19 {strides = array<i32>} : memref<32x48xf32, #tpu.memory_space<vmem>>, vector<14x4xf32>,
    %cst_15 = arith.constant 0.000000e+00 : f32
    %21 = vector.broadcast %cst_15 : f32 to vector<1x4xf32>
    %c0_16 = arith.constant 0 : index
    %c8 = arith.constant 8 : index
    %22 = vector.load %arg21[%c0_16, %c8] : memref<32x48xf32, #tpu.memory_space<vmem>>, vector<1x4xf32>
    tpu.vector_store %arg21[%c0_16, %c8], %21 {strides = array<i32>} : memref<32x48xf32, #tpu.memory_space<vmem>>, vector<1x4xf32>,
    %23 = vector.extract_strided_slice %6 {offsets = [0, 0], sizes = [15, 4], strides = [1, 1]} : vector<32x4xf32> to vector<15x4xf32>
    %c1 = arith.constant 1 : index
    %c8_17 = arith.constant 8 : index
    %24 = vector.load %arg21[%c1, %c8_17] : memref<32x48xf32, #tpu.memory_space<vmem>>, vector<15x4xf32>
    tpu.vector_store %arg21[%c1, %c8_17], %23 {strides = array<i32>} : memref<32x48xf32, #tpu.memory_space<vmem>>, vector<15x4xf32>,
    %cst_18 = arith.constant 0.000000e+00 : f32
    %25 = vector.broadcast %cst_18 : f32 to vector<1x4xf32>
    %c16_19 = arith.constant 16 : index
    %c8_20 = arith.constant 8 : index
    %26 = vector.load %arg21[%c16_19, %c8_20] : memref<32x48xf32, #tpu.memory_space<vmem>>, vector<1x4xf32>
    tpu.vector_store %arg21[%c16_19, %c8_20], %25 {strides = array<i32>} : memref<32x48xf32, #tpu.memory_space<vmem>>, vector<1x4xf32>,
    %27 = vector.extract_strided_slice %6 {offsets = [16, 0], sizes = [15, 4], strides = [1, 1]} : vector<32x4xf32> to vector<15x4xf32>
    %c17 = arith.constant 17 : index
    %c8_21 = arith.constant 8 : index
    %28 = vector.load %arg21[%c17, %c8_21] : memref<32x48xf32, #tpu.memory_space<vmem>>, vector<15x4xf32>
    tpu.vector_store %arg21[%c17, %c8_21], %27 {strides = array<i32>} : memref<32x48xf32, #tpu.memory_space<vmem>>, vector<15x4xf32>,
    %29 = vector.extract_strided_slice %6 {offsets = [0, 0], sizes = [16, 4], strides = [1, 1]} : vector<32x4xf32> to vector<16x4xf32>
    %c0_22 = arith.constant 0 : index
    %c16_23 = arith.constant 16 : index
    %30 = vector.load %arg21[%c0_22, %c16_23] : memref<32x48xf32, #tpu.memory_space<vmem>>, vector<16x4xf32>
    tpu.vector_store %arg21[%c0_22, %c16_23], %29 {strides = array<i32>} : memref<32x48xf32, #tpu.memory_space<vmem>>, vector<16x4xf32>,
    %31 = vector.extract_strided_slice %6 {offsets = [16, 0], sizes = [16, 4], strides = [1, 1]} : vector<32x4xf32> to vector<16x4xf32>
    %c16_24 = arith.constant 16 : index
    %c16_25 = arith.constant 16 : index
    %32 = vector.load %arg21[%c16_24, %c16_25] : memref<32x48xf32, #tpu.memory_space<vmem>>, vector<16x4xf32>
    tpu.vector_store %arg21[%c16_24, %c16_25], %31 {strides = array<i32>} : memref<32x48xf32, #tpu.memory_space<vmem>>, vector<16x4xf32>,
    %cst_26 = arith.constant 0.000000e+00 : f32
    %33 = vector.broadcast %cst_26 : f32 to vector<2x4xf32>
    %c0_27 = arith.constant 0 : index
    %c4 = arith.constant 4 : index
    %34 = vector.load %arg21[%c0_27, %c4] : memref<32x48xf32, #tpu.memory_space<vmem>>, vector<2x4xf32>
    tpu.vector_store %arg21[%c0_27, %c4], %33 {strides = array<i32>} : memref<32x48xf32, #tpu.memory_space<vmem>>, vector<2x4xf32>,
    %35 = vector.extract_strided_slice %12 {offsets = [0, 0], sizes = [14, 4], strides = [1, 1]} : vector<32x4xf32> to vector<14x4xf32>
    %c2_28 = arith.constant 2 : index
    %c4_29 = arith.constant 4 : index
    %36 = vector.load %arg21[%c2_28, %c4_29] : memref<32x48xf32, #tpu.memory_space<vmem>>, vector<14x4xf32>
    tpu.vector_store %arg21[%c2_28, %c4_29], %35 {strides = array<i32>} : memref<32x48xf32, #tpu.memory_space<vmem>>, vector<14x4xf32>,
    %cst_30 = arith.constant 0.000000e+00 : f32
    %37 = vector.broadcast %cst_30 : f32 to vector<2x4xf32>
    %c16_31 = arith.constant 16 : index
    %c4_32 = arith.constant 4 : index
    %38 = vector.load %arg21[%c16_31, %c4_32] : memref<32x48xf32, #tpu.memory_space<vmem>>, vector<2x4xf32>
    tpu.vector_store %arg21[%c16_31, %c4_32], %37 {strides = array<i32>} : memref<32x48xf32, #tpu.memory_space<vmem>>, vector<2x4xf32>,
    %39 = vector.extract_strided_slice %12 {offsets = [16, 0], sizes = [14, 4], strides = [1, 1]} : vector<32x4xf32> to vector<14x4xf32>
    %c18_33 = arith.constant 18 : index
    %c4_34 = arith.constant 4 : index
    %40 = vector.load %arg21[%c18_33, %c4_34] : memref<32x48xf32, #tpu.memory_space<vmem>>, vector<14x4xf32>
    tpu.vector_store %arg21[%c18_33, %c4_34], %39 {strides = array<i32>} : memref<32x48xf32, #tpu.memory_space<vmem>>, vector<14x4xf32>,
    %cst_35 = arith.constant 0.000000e+00 : f32
    %41 = vector.broadcast %cst_35 : f32 to vector<1x4xf32>
    %c0_36 = arith.constant 0 : index
    %c12 = arith.constant 12 : index
    %42 = vector.load %arg21[%c0_36, %c12] : memref<32x48xf32, #tpu.memory_space<vmem>>, vector<1x4xf32>
    tpu.vector_store %arg21[%c0_36, %c12], %41 {strides = array<i32>} : memref<32x48xf32, #tpu.memory_space<vmem>>, vector<1x4xf32>,
    %43 = vector.extract_strided_slice %12 {offsets = [0, 0], sizes = [15, 4], strides = [1, 1]} : vector<32x4xf32> to vector<15x4xf32>
    %c1_37 = arith.constant 1 : index
    %c12_38 = arith.constant 12 : index
    %44 = vector.load %arg21[%c1_37, %c12_38] : memref<32x48xf32, #tpu.memory_space<vmem>>, vector<15x4xf32>
    tpu.vector_store %arg21[%c1_37, %c12_38], %43 {strides = array<i32>} : memref<32x48xf32, #tpu.memory_space<vmem>>, vector<15x4xf32>,
    %cst_39 = arith.constant 0.000000e+00 : f32
    %45 = vector.broadcast %cst_39 : f32 to vector<1x4xf32>
    %c16_40 = arith.constant 16 : index
    %c12_41 = arith.constant 12 : index
    %46 = vector.load %arg21[%c16_40, %c12_41] : memref<32x48xf32, #tpu.memory_space<vmem>>, vector<1x4xf32>
    tpu.vector_store %arg21[%c16_40, %c12_41], %45 {strides = array<i32>} : memref<32x48xf32, #tpu.memory_space<vmem>>, vector<1x4xf32>,
    %47 = vector.extract_strided_slice %12 {offsets = [16, 0], sizes = [15, 4], strides = [1, 1]} : vector<32x4xf32> to vector<15x4xf32>
    %c17_42 = arith.constant 17 : index
    %c12_43 = arith.constant 12 : index
    %48 = vector.load %arg21[%c17_42, %c12_43] : memref<32x48xf32, #tpu.memory_space<vmem>>, vector<15x4xf32>
    tpu.vector_store %arg21[%c17_42, %c12_43], %47 {strides = array<i32>} : memref<32x48xf32, #tpu.memory_space<vmem>>, vector<15x4xf32>,
    %49 = vector.extract_strided_slice %12 {offsets = [0, 0], sizes = [16, 4], strides = [1, 1]} : vector<32x4xf32> to vector<16x4xf32>
    %c0_44 = arith.constant 0 : index
    %c20 = arith.constant 20 : index
    %50 = vector.load %arg21[%c0_44, %c20] : memref<32x48xf32, #tpu.memory_space<vmem>>, vector<16x4xf32>
    tpu.vector_store %arg21[%c0_44, %c20], %49 {strides = array<i32>} : memref<32x48xf32, #tpu.memory_space<vmem>>, vector<16x4xf32>,
    %51 = vector.extract_strided_slice %12 {offsets = [16, 0], sizes = [16, 4], strides = [1, 1]} : vector<32x4xf32> to vector<16x4xf32>
    %c16_45 = arith.constant 16 : index
    %c20_46 = arith.constant 20 : index
    %52 = vector.load %arg21[%c16_45, %c20_46] : memref<32x48xf32, #tpu.memory_space<vmem>>, vector<16x4xf32>
    tpu.vector_store %arg21[%c16_45, %c20_46], %51 {strides = array<i32>} : memref<32x48xf32, #tpu.memory_space<vmem>>, vector<16x4xf32>,
    %c0_47 = arith.constant 0 : index
    %c16_48 = arith.constant 16 : index
    %53 = vector.load %arg21[%c0_47, %c16_48] : memref<32x48xf32, #tpu.memory_space<vmem>>, vector<32x8xf32>
    %c0_49 = arith.constant 0 : index
    %c0_50 = arith.constant 0 : index
    %54 = vector.load %arg21[%c0_49, %c0_50] : memref<32x48xf32, #tpu.memory_space<vmem>>, vector<32x24xf32>
    %c0_51 = arith.constant 0 : index
    %c0_52 = arith.constant 0 : index
    %55 = vector.load %arg5[%c0_51, %c0_52] : memref<24x16xf32, #tpu.memory_space<vmem>>, vector<24x16xf32>
    %cst_53 = arith.constant dense<0.000000e+00> : vector<32x16xf32>
    %56 = tpu.matmul %54, %55, %cst_53 {dimension_numbers = #tpu.dot_dimension_numbers<[1], [0], [0], [1], [0, 0, 1, 1], [], []>} : vector<32x24xf32>, vector<24x16xf32>, vector<32x16xf32> -> vector<32x16xf32>
    %c0_54 = arith.constant 0 : index
    %c0_55 = arith.constant 0 : index
    %57 = vector.load %arg6[%c0_54, %c0_55] : memref<1x16xf32, #tpu.memory_space<vmem>>, vector<1x16xf32>
    %58 = vector.broadcast %57 : vector<1x16xf32> to vector<32x16xf32>
    %59 = arith.mulf %56, %58 : vector<32x16xf32>
    %c0_56 = arith.constant 0 : index
    %c0_57 = arith.constant 0 : index
    %60 = vector.load %arg7[%c0_56, %c0_57] : memref<1x16xf32, #tpu.memory_space<vmem>>, vector<1x16xf32>
    %61 = vector.broadcast %60 : vector<1x16xf32> to vector<32x16xf32>
    %62 = arith.addf %59, %61 : vector<32x16xf32>
    %cst_58 = arith.constant 0.000000e+00 : f32
    %63 = vector.broadcast %cst_58 : f32 to vector<32x16xf32>
    %64 = arith.maximumf %62, %63 : vector<32x16xf32>
    %c0_59 = arith.constant 0 : index
    %c0_60 = arith.constant 0 : index
    %65 = vector.load %arg8[%c0_59, %c0_60] : memref<8x16xf32, #tpu.memory_space<vmem>>, vector<8x16xf32>
    %cst_61 = arith.constant dense<0.000000e+00> : vector<32x16xf32>
    %66 = tpu.matmul %53, %65, %cst_61 {dimension_numbers = #tpu.dot_dimension_numbers<[1], [0], [0], [1], [0, 0, 1, 1], [], []>} : vector<32x8xf32>, vector<8x16xf32>, vector<32x16xf32> -> vector<32x16xf32>
    %c0_62 = arith.constant 0 : index
    %c0_63 = arith.constant 0 : index
    %67 = vector.load %arg9[%c0_62, %c0_63] : memref<1x16xf32, #tpu.memory_space<vmem>>, vector<1x16xf32>
    %68 = vector.broadcast %67 : vector<1x16xf32> to vector<32x16xf32>
    %69 = arith.addf %66, %68 : vector<32x16xf32>
    %70 = arith.addf %64, %69 : vector<32x16xf32>
    %cst_64 = arith.constant 0.000000e+00 : f32
    %71 = vector.broadcast %cst_64 : f32 to vector<4x16xf32>
    %c0_65 = arith.constant 0 : index
    %c0_66 = arith.constant 0 : index
    %72 = vector.load %arg21[%c0_65, %c0_66] : memref<32x48xf32, #tpu.memory_space<vmem>>, vector<4x16xf32>
    tpu.vector_store %arg21[%c0_65, %c0_66], %71 {strides = array<i32>} : memref<32x48xf32, #tpu.memory_space<vmem>>, vector<4x16xf32>,
    %73 = vector.extract_strided_slice %70 {offsets = [0, 0], sizes = [12, 16], strides = [1, 1]} : vector<32x16xf32> to vector<12x16xf32>
    %c4_67 = arith.constant 4 : index
    %c0_68 = arith.constant 0 : index
    %74 = vector.load %arg21[%c4_67, %c0_68] : memref<32x48xf32, #tpu.memory_space<vmem>>, vector<12x16xf32>
    tpu.vector_store %arg21[%c4_67, %c0_68], %73 {strides = array<i32>} : memref<32x48xf32, #tpu.memory_space<vmem>>, vector<12x16xf32>,
    %cst_69 = arith.constant 0.000000e+00 : f32
    %75 = vector.broadcast %cst_69 : f32 to vector<4x16xf32>
    %c16_70 = arith.constant 16 : index
    %c0_71 = arith.constant 0 : index
    %76 = vector.load %arg21[%c16_70, %c0_71] : memref<32x48xf32, #tpu.memory_space<vmem>>, vector<4x16xf32>
    tpu.vector_store %arg21[%c16_70, %c0_71], %75 {strides = array<i32>} : memref<32x48xf32, #tpu.memory_space<vmem>>, vector<4x16xf32>,
    %77 = vector.extract_strided_slice %70 {offsets = [16, 0], sizes = [12, 16], strides = [1, 1]} : vector<32x16xf32> to vector<12x16xf32>
    %c20_72 = arith.constant 20 : index
    %c0_73 = arith.constant 0 : index
    %78 = vector.load %arg21[%c20_72, %c0_73] : memref<32x48xf32, #tpu.memory_space<vmem>>, vector<12x16xf32>
    tpu.vector_store %arg21[%c20_72, %c0_73], %77 {strides = array<i32>} : memref<32x48xf32, #tpu.memory_space<vmem>>, vector<12x16xf32>,
    %cst_74 = arith.constant 0.000000e+00 : f32
    %79 = vector.broadcast %cst_74 : f32 to vector<2x16xf32>
    %c0_75 = arith.constant 0 : index
    %c16_76 = arith.constant 16 : index
    %80 = vector.load %arg21[%c0_75, %c16_76] : memref<32x48xf32, #tpu.memory_space<vmem>>, vector<2x16xf32>
    tpu.vector_store %arg21[%c0_75, %c16_76], %79 {strides = array<i32>} : memref<32x48xf32, #tpu.memory_space<vmem>>, vector<2x16xf32>,
    %81 = vector.extract_strided_slice %70 {offsets = [0, 0], sizes = [14, 16], strides = [1, 1]} : vector<32x16xf32> to vector<14x16xf32>
    %c2_77 = arith.constant 2 : index
    %c16_78 = arith.constant 16 : index
    %82 = vector.load %arg21[%c2_77, %c16_78] : memref<32x48xf32, #tpu.memory_space<vmem>>, vector<14x16xf32>
    tpu.vector_store %arg21[%c2_77, %c16_78], %81 {strides = array<i32>} : memref<32x48xf32, #tpu.memory_space<vmem>>, vector<14x16xf32>,
    %cst_79 = arith.constant 0.000000e+00 : f32
    %83 = vector.broadcast %cst_79 : f32 to vector<2x16xf32>
    %c16_80 = arith.constant 16 : index
    %c16_81 = arith.constant 16 : index
    %84 = vector.load %arg21[%c16_80, %c16_81] : memref<32x48xf32, #tpu.memory_space<vmem>>, vector<2x16xf32>
    tpu.vector_store %arg21[%c16_80, %c16_81], %83 {strides = array<i32>} : memref<32x48xf32, #tpu.memory_space<vmem>>, vector<2x16xf32>,
    %85 = vector.extract_strided_slice %70 {offsets = [16, 0], sizes = [14, 16], strides = [1, 1]} : vector<32x16xf32> to vector<14x16xf32>
    %c18_82 = arith.constant 18 : index
    %c16_83 = arith.constant 16 : index
    %86 = vector.load %arg21[%c18_82, %c16_83] : memref<32x48xf32, #tpu.memory_space<vmem>>, vector<14x16xf32>
    tpu.vector_store %arg21[%c18_82, %c16_83], %85 {strides = array<i32>} : memref<32x48xf32, #tpu.memory_space<vmem>>, vector<14x16xf32>,
    %87 = vector.extract_strided_slice %70 {offsets = [0, 0], sizes = [16, 16], strides = [1, 1]} : vector<32x16xf32> to vector<16x16xf32>
    %c0_84 = arith.constant 0 : index
    %c32 = arith.constant 32 : index
    %88 = vector.load %arg21[%c0_84, %c32] : memref<32x48xf32, #tpu.memory_space<vmem>>, vector<16x16xf32>
    tpu.vector_store %arg21[%c0_84, %c32], %87 {strides = array<i32>} : memref<32x48xf32, #tpu.memory_space<vmem>>, vector<16x16xf32>,
    %89 = vector.extract_strided_slice %70 {offsets = [16, 0], sizes = [16, 16], strides = [1, 1]} : vector<32x16xf32> to vector<16x16xf32>
    %c16_85 = arith.constant 16 : index
    %c32_86 = arith.constant 32 : index
    %90 = vector.load %arg21[%c16_85, %c32_86] : memref<32x48xf32, #tpu.memory_space<vmem>>, vector<16x16xf32>
    tpu.vector_store %arg21[%c16_85, %c32_86], %89 {strides = array<i32>} : memref<32x48xf32, #tpu.memory_space<vmem>>, vector<16x16xf32>,
    %c0_87 = arith.constant 0 : index
    %c0_88 = arith.constant 0 : index
    %91 = vector.load %arg21[%c0_87, %c0_88] : memref<32x48xf32, #tpu.memory_space<vmem>>, vector<32x48xf32>
    %c0_89 = arith.constant 0 : index
    %c0_90 = arith.constant 0 : index
    %92 = vector.load %arg10[%c0_89, %c0_90] : memref<48x16xf32, #tpu.memory_space<vmem>>, vector<48x16xf32>
    %cst_91 = arith.constant dense<0.000000e+00> : vector<32x16xf32>
    %93 = tpu.matmul %91, %92, %cst_91 {dimension_numbers = #tpu.dot_dimension_numbers<[1], [0], [0], [1], [0, 0, 1, 1], [], []>} : vector<32x48xf32>, vector<48x16xf32>, vector<32x16xf32> -> vector<32x16xf32>
    %c0_92 = arith.constant 0 : index
    %c0_93 = arith.constant 0 : index
    %94 = vector.load %arg11[%c0_92, %c0_93] : memref<1x16xf32, #tpu.memory_space<vmem>>, vector<1x16xf32>
    %95 = vector.broadcast %94 : vector<1x16xf32> to vector<32x16xf32>
    %96 = arith.mulf %93, %95 : vector<32x16xf32>
    %c0_94 = arith.constant 0 : index
    %c0_95 = arith.constant 0 : index
    %97 = vector.load %arg12[%c0_94, %c0_95] : memref<1x16xf32, #tpu.memory_space<vmem>>, vector<1x16xf32>
    %98 = vector.broadcast %97 : vector<1x16xf32> to vector<32x16xf32>
    %99 = arith.addf %96, %98 : vector<32x16xf32>
    %cst_96 = arith.constant 0.000000e+00 : f32
    %100 = vector.broadcast %cst_96 : f32 to vector<32x16xf32>
    %101 = arith.maximumf %99, %100 : vector<32x16xf32>
    %102 = arith.addf %101, %70 : vector<32x16xf32>
    %cst_97 = arith.constant 0.000000e+00 : f32
    %103 = vector.broadcast %cst_97 : f32 to vector<8x16xf32>
    %c0_98 = arith.constant 0 : index
    %c0_99 = arith.constant 0 : index
    %104 = vector.load %arg21[%c0_98, %c0_99] : memref<32x48xf32, #tpu.memory_space<vmem>>, vector<8x16xf32>
    tpu.vector_store %arg21[%c0_98, %c0_99], %103 {strides = array<i32>} : memref<32x48xf32, #tpu.memory_space<vmem>>, vector<8x16xf32>,
    %105 = vector.extract_strided_slice %102 {offsets = [0, 0], sizes = [8, 16], strides = [1, 1]} : vector<32x16xf32> to vector<8x16xf32>
    %c8_100 = arith.constant 8 : index
    %c0_101 = arith.constant 0 : index
    %106 = vector.load %arg21[%c8_100, %c0_101] : memref<32x48xf32, #tpu.memory_space<vmem>>, vector<8x16xf32>
    tpu.vector_store %arg21[%c8_100, %c0_101], %105 {strides = array<i32>} : memref<32x48xf32, #tpu.memory_space<vmem>>, vector<8x16xf32>,
    %cst_102 = arith.constant 0.000000e+00 : f32
    %107 = vector.broadcast %cst_102 : f32 to vector<8x16xf32>
    %c16_103 = arith.constant 16 : index
    %c0_104 = arith.constant 0 : index
    %108 = vector.load %arg21[%c16_103, %c0_104] : memref<32x48xf32, #tpu.memory_space<vmem>>, vector<8x16xf32>
    tpu.vector_store %arg21[%c16_103, %c0_104], %107 {strides = array<i32>} : memref<32x48xf32, #tpu.memory_space<vmem>>, vector<8x16xf32>,
    %109 = vector.extract_strided_slice %102 {offsets = [16, 0], sizes = [8, 16], strides = [1, 1]} : vector<32x16xf32> to vector<8x16xf32>
    %c24 = arith.constant 24 : index
    %c0_105 = arith.constant 0 : index
    %110 = vector.load %arg21[%c24, %c0_105] : memref<32x48xf32, #tpu.memory_space<vmem>>, vector<8x16xf32>
    tpu.vector_store %arg21[%c24, %c0_105], %109 {strides = array<i32>} : memref<32x48xf32, #tpu.memory_space<vmem>>, vector<8x16xf32>,
    %cst_106 = arith.constant 0.000000e+00 : f32
    %111 = vector.broadcast %cst_106 : f32 to vector<4x16xf32>
    %c0_107 = arith.constant 0 : index
    %c16_108 = arith.constant 16 : index
    %112 = vector.load %arg21[%c0_107, %c16_108] : memref<32x48xf32, #tpu.memory_space<vmem>>, vector<4x16xf32>
    tpu.vector_store %arg21[%c0_107, %c16_108], %111 {strides = array<i32>} : memref<32x48xf32, #tpu.memory_space<vmem>>, vector<4x16xf32>,
    %113 = vector.extract_strided_slice %102 {offsets = [0, 0], sizes = [12, 16], strides = [1, 1]} : vector<32x16xf32> to vector<12x16xf32>
    %c4_109 = arith.constant 4 : index
    %c16_110 = arith.constant 16 : index
    %114 = vector.load %arg21[%c4_109, %c16_110] : memref<32x48xf32, #tpu.memory_space<vmem>>, vector<12x16xf32>
    tpu.vector_store %arg21[%c4_109, %c16_110], %113 {strides = array<i32>} : memref<32x48xf32, #tpu.memory_space<vmem>>, vector<12x16xf32>,
    %cst_111 = arith.constant 0.000000e+00 : f32
    %115 = vector.broadcast %cst_111 : f32 to vector<4x16xf32>
    %c16_112 = arith.constant 16 : index
    %c16_113 = arith.constant 16 : index
    %116 = vector.load %arg21[%c16_112, %c16_113] : memref<32x48xf32, #tpu.memory_space<vmem>>, vector<4x16xf32>
    tpu.vector_store %arg21[%c16_112, %c16_113], %115 {strides = array<i32>} : memref<32x48xf32, #tpu.memory_space<vmem>>, vector<4x16xf32>,
    %117 = vector.extract_strided_slice %102 {offsets = [16, 0], sizes = [12, 16], strides = [1, 1]} : vector<32x16xf32> to vector<12x16xf32>
    %c20_114 = arith.constant 20 : index
    %c16_115 = arith.constant 16 : index
    %118 = vector.load %arg21[%c20_114, %c16_115] : memref<32x48xf32, #tpu.memory_space<vmem>>, vector<12x16xf32>
    tpu.vector_store %arg21[%c20_114, %c16_115], %117 {strides = array<i32>} : memref<32x48xf32, #tpu.memory_space<vmem>>, vector<12x16xf32>,
    %119 = vector.extract_strided_slice %102 {offsets = [0, 0], sizes = [16, 16], strides = [1, 1]} : vector<32x16xf32> to vector<16x16xf32>
    %c0_116 = arith.constant 0 : index
    %c32_117 = arith.constant 32 : index
    %120 = vector.load %arg21[%c0_116, %c32_117] : memref<32x48xf32, #tpu.memory_space<vmem>>, vector<16x16xf32>
    tpu.vector_store %arg21[%c0_116, %c32_117], %119 {strides = array<i32>} : memref<32x48xf32, #tpu.memory_space<vmem>>, vector<16x16xf32>,
    %121 = vector.extract_strided_slice %102 {offsets = [16, 0], sizes = [16, 16], strides = [1, 1]} : vector<32x16xf32> to vector<16x16xf32>
    %c16_118 = arith.constant 16 : index
    %c32_119 = arith.constant 32 : index
    %122 = vector.load %arg21[%c16_118, %c32_119] : memref<32x48xf32, #tpu.memory_space<vmem>>, vector<16x16xf32>
    tpu.vector_store %arg21[%c16_118, %c32_119], %121 {strides = array<i32>} : memref<32x48xf32, #tpu.memory_space<vmem>>, vector<16x16xf32>,
    %c0_120 = arith.constant 0 : index
    %c0_121 = arith.constant 0 : index
    %123 = vector.load %arg21[%c0_120, %c0_121] : memref<32x48xf32, #tpu.memory_space<vmem>>, vector<32x48xf32>
    %c0_122 = arith.constant 0 : index
    %c0_123 = arith.constant 0 : index
    %124 = vector.load %arg13[%c0_122, %c0_123] : memref<48x32xf32, #tpu.memory_space<vmem>>, vector<48x32xf32>
    %cst_124 = arith.constant dense<0.000000e+00> : vector<32x32xf32>
    %125 = tpu.matmul %123, %124, %cst_124 {dimension_numbers = #tpu.dot_dimension_numbers<[1], [0], [0], [1], [0, 0, 1, 1], [], []>} : vector<32x48xf32>, vector<48x32xf32>, vector<32x32xf32> -> vector<32x32xf32>
    %c0_125 = arith.constant 0 : index
    %c0_126 = arith.constant 0 : index
    %126 = vector.load %arg14[%c0_125, %c0_126] : memref<1x32xf32, #tpu.memory_space<vmem>>, vector<1x32xf32>
    %127 = vector.broadcast %126 : vector<1x32xf32> to vector<32x32xf32>
    %128 = arith.mulf %125, %127 : vector<32x32xf32>
    %c0_127 = arith.constant 0 : index
    %c0_128 = arith.constant 0 : index
    %129 = vector.load %arg15[%c0_127, %c0_128] : memref<1x32xf32, #tpu.memory_space<vmem>>, vector<1x32xf32>
    %130 = vector.broadcast %129 : vector<1x32xf32> to vector<32x32xf32>
    %131 = arith.addf %128, %130 : vector<32x32xf32>
    %cst_129 = arith.constant 0.000000e+00 : f32
    %132 = vector.broadcast %cst_129 : f32 to vector<32x32xf32>
    %133 = arith.maximumf %131, %132 : vector<32x32xf32>
    %c0_130 = arith.constant 0 : index
    %c0_131 = arith.constant 0 : index
    %134 = vector.load %arg16[%c0_130, %c0_131] : memref<16x32xf32, #tpu.memory_space<vmem>>, vector<16x32xf32>
    %cst_132 = arith.constant dense<0.000000e+00> : vector<32x32xf32>
    %135 = tpu.matmul %102, %134, %cst_132 {dimension_numbers = #tpu.dot_dimension_numbers<[1], [0], [0], [1], [0, 0, 1, 1], [], []>} : vector<32x16xf32>, vector<16x32xf32>, vector<32x32xf32> -> vector<32x32xf32>
    %c0_133 = arith.constant 0 : index
    %c0_134 = arith.constant 0 : index
    %136 = vector.load %arg17[%c0_133, %c0_134] : memref<1x32xf32, #tpu.memory_space<vmem>>, vector<1x32xf32>
    %137 = vector.broadcast %136 : vector<1x32xf32> to vector<32x32xf32>
    %138 = arith.addf %135, %137 : vector<32x32xf32>
    %139 = arith.addf %133, %138 : vector<32x32xf32>
    %140 = tpu.iota {dimensions = array<i32: 0>} : vector<2x32xi32>
    %141 = tpu.iota {dimensions = array<i32: 1>} : vector<2x32xi32>
    %c16_i32 = arith.constant 16 : i32
    %142 = vector.broadcast %c16_i32 : i32 to vector<2x32xi32>
    %143 = arith.muli %140, %142 : vector<2x32xi32>
    %144 = arith.cmpi sge, %141, %143 : vector<2x32xi32>
    %c1_i32 = arith.constant 1 : i32
    %145 = vector.broadcast %c1_i32 : i32 to vector<2x32xi32>
    %146 = arith.addi %140, %145 : vector<2x32xi32>
    %c16_i32_135 = arith.constant 16 : i32
    %147 = vector.broadcast %c16_i32_135 : i32 to vector<2x32xi32>
    %148 = arith.muli %146, %147 : vector<2x32xi32>
    %149 = arith.cmpi slt, %141, %148 : vector<2x32xi32>
    %150 = arith.andi %144, %149 : vector<2x32xi1>
    %cst_136 = arith.constant 6.250000e-02 : f32
    %cst_137 = arith.constant 0.000000e+00 : f32
    %151 = vector.broadcast %cst_136 : f32 to vector<2x32xf32>
    %152 = vector.broadcast %cst_137 : f32 to vector<2x32xf32>
    %153 = arith.select %150, %151, %152 : vector<2x32xi1>, vector<2x32xf32>
    %cst_138 = arith.constant dense<0.000000e+00> : vector<2x32xf32>
    %154 = tpu.matmul %153, %139, %cst_138 {dimension_numbers = #tpu.dot_dimension_numbers<[1], [0], [0], [1], [0, 0, 1, 1], [], []>} : vector<2x32xf32>, vector<32x32xf32>, vector<2x32xf32> -> vector<2x32xf32>
    %c0_139 = arith.constant 0 : index
    %c0_140 = arith.constant 0 : index
    %155 = vector.load %arg18[%c0_139, %c0_140] : memref<32x5xf32, #tpu.memory_space<vmem>>, vector<32x5xf32>
    %cst_141 = arith.constant dense<0.000000e+00> : vector<2x5xf32>
    %156 = tpu.matmul %154, %155, %cst_141 {dimension_numbers = #tpu.dot_dimension_numbers<[1], [0], [0], [1], [0, 0, 1, 1], [], []>} : vector<2x32xf32>, vector<32x5xf32>, vector<2x5xf32> -> vector<2x5xf32>
    %c0_142 = arith.constant 0 : index
    %c0_143 = arith.constant 0 : index
    %157 = vector.load %arg19[%c0_142, %c0_143] : memref<1x5xf32, #tpu.memory_space<vmem>>, vector<1x5xf32>
    %158 = vector.broadcast %157 : vector<1x5xf32> to vector<2x5xf32>
    %159 = arith.addf %156, %158 : vector<2x5xf32>
    %c0_144 = arith.constant 0 : index
    %c0_145 = arith.constant 0 : index
    %160 = vector.load %arg20[%c0_144, %c0_145] : memref<2x5xf32, #tpu.memory_space<vmem>>, vector<2x5xf32>
    tpu.vector_store %arg20[%c0_144, %c0_145], %159 {strides = array<i32>} : memref<2x5xf32, #tpu.memory_space<vmem>>, vector<2x5xf32>,
    return
  }
}

</mosaic_0001>

<bundles_post_ra>
// kernel: tpu_custom_call.1
= control target key start
LH: loop header
LB: loop body
LE: loop exit
PB: predicated region body
PF: predicated region fallthrough
CT: control target
= control target key end

     0   :  { %s1717_s0 = inlined_call_operand.vmem [shape: f32[32,4], index: 0, kind: input, shape index: {}]   ;;  %s1718_s1 = inlined_call_operand.vmem [shape: f32[1,4], index: 1, kind: input, shape index: {}]   ;;  %s1719_s2 = inlined_call_operand.vmem [shape: f32[1,4], index: 2, kind: input, shape index: {}]   ;;  %s1720_s3 = inlined_call_operand.vmem [shape: f32[1,4], index: 3, kind: input, shape index: {}]   ;;  %s1721_s4 = inlined_call_operand.vmem [shape: f32[1,4], index: 4, kind: input, shape index: {}]   ;;  %s1722_s5 = inlined_call_operand.vmem [shape: f32[24,16], index: 5, kind: input, shape index: {}]   ;;  %s1723_s6 = inlined_call_operand.vmem [shape: f32[1,16], index: 6, kind: input, shape index: {}]   ;;  %s1724_s7 = inlined_call_operand.vmem [shape: f32[1,16], index: 7, kind: input, shape index: {}]   ;;  %s1725_s8 = inlined_call_operand.vmem [shape: f32[8,16], index: 8, kind: input, shape index: {}]   ;;  %s1726_s9 = inlined_call_operand.vmem [shape: f32[1,16], index: 9, kind: input, shape index: {}]   ;;  %s1727_s10 = inlined_call_operand.vmem [shape: f32[48,16], index: 10, kind: input, shape index: {}]   ;;  %s1728_s11 = inlined_call_operand.vmem [shape: f32[1,16], index: 11, kind: input, shape index: {}]   ;;  %s1729_s12 = inlined_call_operand.vmem [shape: f32[1,16], index: 12, kind: input, shape index: {}]   ;;  %s1730_s13 = inlined_call_operand.vmem [shape: f32[48,32], index: 13, kind: input, shape index: {}]   ;;  %s1731_s14 = inlined_call_operand.vmem [shape: f32[1,32], index: 14, kind: input, shape index: {}]   ;;  %s1732_s15 = inlined_call_operand.vmem [shape: f32[1,32], index: 15, kind: input, shape index: {}]   ;;  %s1733_s16 = inlined_call_operand.vmem [shape: f32[16,32], index: 16, kind: input, shape index: {}]   ;;  %s1734_s17 = inlined_call_operand.vmem [shape: f32[1,32], index: 17, kind: input, shape index: {}]   ;;  %s1735_s18 = inlined_call_operand.vmem [shape: f32[32,5], index: 18, kind: input, shape index: {}]   ;;  %s1736_s19 = inlined_call_operand.vmem [shape: f32[1,5], index: 19, kind: input, shape index: {}]   ;;  %s1737_s20 = inlined_call_operand.hbm [shape: f32[2,5], index: 20, kind: output, shape index: {}]  }
   0x1   :  { %1739 = sst [smem:[#allocation6_spill]] %s1717_s0 }
   0x2   :  { %1740 = sst [smem:[#allocation7_spill]] %s1718_s1 }
   0x3   :  { %1741 = sst [smem:[#allocation8_spill]] %s1719_s2 }
   0x4   :  { %1742 = sst [smem:[#allocation9_spill]] %s1720_s3 }
   0x5   :  { %1743 = sst [smem:[#allocation10_spill]] %s1721_s4 }
   0x6   :  { %1744 = sst [smem:[#allocation11_spill]] %s1732_s15 }
   0x7   :  { %s1745_s23 = sld [smem:[#allocation6_spill]]  ;;  %vm114_vm0 = vcmask 25600  }
   0x8   :  { %s1746_s15 = sld [smem:[#allocation7_spill]] }
   0x9   :  { %s1747_s26 = sld [smem:[#allocation8_spill]] }
   0xa   :  { %s1748_s30 = sld [smem:[#allocation9_spill]] }
   0xd   :  { %v66_v0 = vld [vmem:[%s1745_s23] sm:$0xff]  ;;  %v67_v4 = vld [vmem:[%s1745_s23 + $0x8] sm:$0xff]  ;;  %v68_v7 = vld [vmem:[%s1745_s23 + $0x10] sm:$0xff] }
   0xe   :  { %v1128_v1 = vld [vmem:[%s1746_s15] ss:$0 sm:$0xff]  ;;  %v69_v8 = vld [vmem:[%s1745_s23 + $0x18] sm:$0xff] }
   0xf   :  { %v1129_v2 = vld [vmem:[%s1747_s26] ss:$0 sm:$0xff]  ;;  %v77_v3 = vmul.f32 %v1128_v1, %v66_v0  ;;  %v78_v6 = vmul.f32 %v1128_v1, %v67_v4  ;;  %v79_v10 = vmul.f32 %v1128_v1, %v68_v7  ;;  %v80_v11 = vmul.f32 %v1128_v1, %v69_v8 }
  0x10   :  { %v1130_v5 = vld [vmem:[%s1748_s30] ss:$0 sm:$0xff] }
  0x11   :  { %v88_v9 = vadd.f32 %v1129_v2, %v77_v3 }
  0x12   :  { %25 = vsyncpa [#allocation4], 0  ;;  %v100_v12 = vmul.f32 %v1130_v5, %v67_v4  ;;  %s1331_s22 = smov 16   ;;  %s1332_s24 = smov 8   ;;  %v89_v13 = vadd.f32 %v1129_v2, %v78_v6  ;;  %v99_v14 = vmul.f32 %v1130_v5, %v66_v0  ;;  %v90_v15 = vadd.f32 %v1129_v2, %v79_v10  ;;  %v234_v21 = vld [vmem:[%s1722_s5 + $0x10] sm:$0xff]  ;;  %v233_v22 = vld [vmem:[%s1722_s5 + $0x8] sm:$0xff] }
  0x13   :  { %148 = vrot.lane.b32.xlu1 %v88_v9, %s1331_s22  ;;  %127 = vrot.lane.b32.xlu0 %v88_v9, %s1332_s24  ;;  %s1749_s3 = sld [smem:[#allocation10_spill]]  ;;  %v91_v17 = vadd.f32 %v1129_v2, %v80_v11  ;;  %v1333_v18 = vmov 0.0   ;;  %vm116_vm1 = vcmask 31744   ;;  %vm123_vm2 = vcmask 90176   ;;  %s1334_s23 = smov 4   ;;  %v232_v23 = vld [vmem:[%s1722_s5] sm:$0xff] }
  0x14   :  { %115 = vst.msk [vmem:[#allocation2] sm:$0x3] %vm114_vm0, %v1333_v18  ;;  %120 = vst.msk [vmem:[#allocation2 + $0x10] sm:$0x3] %vm114_vm0, %v1333_v18  ;;  %vm118_vm3 = vcmask 29696   ;;  %s1335_s26 = smov 12   ;;  %1211 = vmatprep.subr.mxu0 %v234_v21  ;;  %v101_v24 = vmul.f32 %v1130_v5, %v68_v7  ;;  %v102_v25 = vmul.f32 %v1130_v5, %v69_v8 }
  0x15   :  { %124 = vst.msk [vmem:[#allocation2] sm:$0x1] %vm123_vm2, %v1333_v18  ;;  %137 = vst.msk [vmem:[#allocation2 + $0x10] sm:$0x1] %vm123_vm2, %v1333_v18  ;;  %1212 = vmatpush3.msra.mxu0 %v234_v21  ;;  %s1336_s21 = smov 20   ;;  %vm133_vm4 = vcmask 97344  }
  0x16   :  { %117 = vst.msk [vmem:[#allocation2 + $0x2] sm:$0xff] %vm116_vm1, %v88_v9  ;;  %121 = vst.msk [vmem:[#allocation2 + $0x12] sm:$0xff] %vm116_vm1, %v90_v15  ;;  %1213 = vmatprep.subr.mxu0 %v233_v22  ;;  %vm154_vm5 = vcmask 162944   ;;  %vm165_vm6 = vcmask 58400   ;;  %vm190_vm7 = vcmask 122976   ;;  %vm135_vm8 = vcmask 96320  }
  0x17   :  { %119 = vst.msk [vmem:[#allocation2 + $0xa] sm:$0x3f] %vm118_vm3, %v89_v13  ;;  %122 = vst.msk [vmem:[#allocation2 + $0x1a] sm:$0x3f] %vm118_vm3, %v91_v17  ;;  %150 = vrot.lane.b32.xlu1 %v89_v13, %s1331_s22  ;;  %129 = vrot.lane.b32.xlu0 %v89_v13, %s1332_s24  ;;  %vm177_vm9 = vcmask 62496   ;;  %vm175_vm10 = vcmask 64544  }
  0x18   :  { %1214 = vmatpush3.msra.mxu0 %v233_v22  ;;  %vm198_vm11 = vcmask 130144   ;;  %vm200_vm12 = vcmask 129120   ;;  %v359_v38 = vld [vmem:[%s1725_s8] sm:$0xff]  ;;  %vm217_vm13 = vcmask 195744   ;;  %vm235_vm14 = vcmask 195584   ;;  %s1337_s8 = smov 112  }
  0x19   :  { %v1131_v16 = vld [vmem:[%s1749_s3] ss:$0 sm:$0xff]  ;;  %1215 = vmatprep.subr.mxu0 %v232_v23  ;;  %1223 = vmatprep.subr.mxu1 %v359_v38  ;;  %vm481_vm15 = vcmask 255104   ;;  %vm473_vm0 = vcmask 125952   ;;  %vm375_vm1 = vcmask 64512   ;;  %v532_v62 = vld [vmem:[%s1727_s10 + $0x28] sm:$0xff] }
  0x1a   :  { %v111_v19 = vadd.f32 %v1131_v16, %v100_v12  ;;  %v110_v20 = vadd.f32 %v1131_v16, %v99_v14  ;;  %1216 = vmatpush3.msra.mxu0 %v232_v23  ;;  %v112_v26 = vadd.f32 %v1131_v16, %v101_v24  ;;  %v113_v27 = vadd.f32 %v1131_v16, %v102_v25  ;;  %v1136_v58 = vld [vmem:[%s1723_s6] ss:$0 sm:$0xff]  ;;  %v530_v3 = vld [vmem:[%s1727_s10 + $0x18] sm:$0xff]  ;;  %v529_v4 = vld [vmem:[%s1727_s10 + $0x10] sm:$0xff]  ;;  %s1750_s2 = sld [smem:[#allocation11_spill]] }
  0x1b   :  { %1224 = vmatpush3.msra.mxu1 %v359_v38  ;;  %v1137_v61 = vld [vmem:[%s1724_s7] ss:$0 sm:$0xff]  ;;  %v528_v7 = vld [vmem:[%s1727_s10 + $0x8] sm:$0xff]  ;;  %vm475_vm2 = vcmask 130048   ;;  %vm493_vm3 = vcmask 259200  }
  0x1c   :  { %171 = vrot.lane.b32.xlu1 %v111_v19, %s1334_s23  ;;  %169 = vrot.lane.b32.xlu0 %v110_v20, %s1334_s23  ;;  %v531_v0 = vld [vmem:[%s1727_s10 + $0x20] sm:$0xff] }
  0x1d   :  { %1231 = vmatprep.subr.mxu1 %v532_v62  ;;  %v1138_v2 = vld [vmem:[%s1726_s9] ss:$0 sm:$0xff] }
  0x20   :  { %140 = vrot.lane.b32.xlu1 %v90_v15, %s1332_s24  ;;  %192 = vrot.lane.b32.xlu0 %v110_v20, %s1335_s26 }
  0x24   :  { %194 = vrot.lane.b32.xlu1 %v111_v19, %s1335_s26  ;;  %142 = vrot.lane.b32.xlu0 %v91_v17, %s1332_s24 }
  0x28   :  { %157 = vrot.lane.b32.xlu1 %v90_v15, %s1331_s22  ;;  %211 = vrot.lane.b32.xlu0 %v110_v20, %s1336_s21  ;;  %v527_v15 = vld [vmem:[%s1727_s10] sm:$0xff]  ;;  %s1338_s10 = smov 32  }
  0x2c   :  { %213 = vrot.lane.b32.xlu1 %v111_v19, %s1336_s21  ;;  %159 = vrot.lane.b32.xlu0 %v91_v17, %s1331_s22 }
  0x30   :  { %182 = vrot.lane.b32.xlu0 %v112_v26, %s1334_s23  ;;  %184 = vrot.lane.b32.xlu1 %v113_v27, %s1334_s23 }
  0x34   :  { %203 = vrot.lane.b32.xlu0 %v112_v26, %s1335_s26  ;;  %205 = vrot.lane.b32.xlu1 %v113_v27, %s1335_s26  ;;  %s1340_s26 = smov [#allocation3]  }
  0x35   :  { %s1120_s27 = sshll.u32 %s1340_s26, 4  ;;  %s1121_s27 = int_to_ptr.vmem [resolvable:$true] %s1120_s27 }
  0x36   :  { %s1309_s6 = scalar_lea.vmem %s1121_s27, 32  ;;  %p1314_p1 = scmp.lt.s32.totalorder %s1121_s27, %s1121_s27 }
  0x37   :  { %p1310_p0 = scmp.ne.s32.totalorder %s1121_s27, %s1309_s6  ;;  %p1315_p2 = scmp.lt.s32.totalorder %s1309_s6, %s1309_s6 }
  0x38   :  { %220 = vrot.lane.b32.xlu0 %v112_v26, %s1336_s21  ;;  %222 = vrot.lane.b32.xlu1 %v113_v27, %s1336_s21 }
  0x39   :  { %p1316_p3 = por %p1315_p2, %p1314_p1 }
  0x3b   :  { %p1317_p4 = pnand %p1316_p3, %p1310_p0 }
  0x85   :  { %v149_v28 = vpop.permute.xlu1 %148  ;;  %v128_v29 = vpop.permute.xlu0 %127 }
  0x86   :  { %134 = vst.msk [vmem:[#allocation2 + $0x1] sm:$0xff] %vm133_vm4, %v128_v29 }
  0x87   :  { %155 = vst.msk [vmem:[#allocation2] sm:$0xff] %vm154_vm5, %v149_v28 }
  0x88   :  { %166 = vst.msk [vmem:[#allocation2] sm:$0x3] %vm165_vm6, %v1333_v18 }
  0x89   :  { %v151_v30 = vpop.permute.xlu1 %150  ;;  %v130_v31 = vpop.permute.xlu0 %129  ;;  %191 = vst.msk [vmem:[#allocation2] sm:$0x1] %vm190_vm7, %v1333_v18 }
  0x8a   :  { %136 = vst.msk [vmem:[#allocation2 + $0x9] sm:$0x7f] %vm135_vm8, %v130_v31 }
  0x8b   :  { %156 = vst.msk [vmem:[#allocation2 + $0x8] sm:$0xff] %vm154_vm5, %v151_v30 }
  0x8e   :  { %v172_v32 = vpop.permute.xlu1 %171  ;;  %v170_v33 = vpop.permute.xlu0 %169 }
  0x8f   :  { %178 = vst.msk [vmem:[#allocation2 + $0xa] sm:$0x3f] %vm177_vm9, %v172_v32 }
  0x90   :  { %176 = vst.msk [vmem:[#allocation2 + $0x2] sm:$0xff] %vm175_vm10, %v170_v33 }
  0x92   :  { %v141_v34 = vpop.permute.xlu1 %140  ;;  %v193_v35 = vpop.permute.xlu0 %192 }
  0x93   :  { %146 = vst.msk [vmem:[#allocation2 + $0x11] sm:$0xff] %vm133_vm4, %v141_v34  ;;  %vm491_vm4 = vcmask 261248  }
  0x94   :  { %199 = vst.msk [vmem:[#allocation2 + $0x1] sm:$0xff] %vm198_vm11, %v193_v35 }
  0x96   :  { %v195_v36 = vpop.permute.xlu1 %194  ;;  %v143_v37 = vpop.permute.xlu0 %142 }
  0x97   :  { %201 = vst.msk [vmem:[#allocation2 + $0x9] sm:$0x7f] %vm200_vm12, %v195_v36 }
  0x98   :  { %147 = vst.msk [vmem:[#allocation2 + $0x19] sm:$0x7f] %vm135_vm8, %v143_v37  ;;  %vm1339_vm8 = vmmov 0  }
  0x9a   :  { %v158_v39 = vpop.permute.xlu1 %157  ;;  %v212_v40 = vpop.permute.xlu0 %211 }
  0x9b   :  { %163 = vst.msk [vmem:[#allocation2 + $0x10] sm:$0xff] %vm154_vm5, %v158_v39 }
  0x9c   :  { %218 = vst.msk [vmem:[#allocation2] sm:$0xff] %vm217_vm13, %v212_v40 }
  0x9d   :  { %179 = vst.msk [vmem:[#allocation2 + $0x10] sm:$0x3] %vm165_vm6, %v1333_v18  ;;  %vm533_vm6 = vcmask 392192  }
  0x9e   :  { %202 = vst.msk [vmem:[#allocation2 + $0x10] sm:$0x1] %vm190_vm7, %v1333_v18  ;;  %v214_v41 = vpop.permute.xlu1 %213  ;;  %v160_v42 = vpop.permute.xlu0 %159  ;;  %vm665_vm7 = vcmask 257152  }
  0x9f   :  { %219 = vst.msk [vmem:[#allocation2 + $0x8] sm:$0xff] %vm217_vm13, %v214_v41 }
  0xa0   :  { %164 = vst.msk [vmem:[#allocation2 + $0x18] sm:$0xff] %vm154_vm5, %v160_v42  ;;  %vm512_vm5 = vcmask 392448  }
  0xa2   :  { %v183_v44 = vpop.permute.xlu0 %182  ;;  %v185_v45 = vpop.permute.xlu1 %184 }
  0xa3   :  { %v228_v43 = vld [vmem:[#allocation2] sm:$0xff]  ;;  %188 = vst.msk [vmem:[#allocation2 + $0x12] sm:$0xff] %vm175_vm10, %v183_v44 }
  0xa4   :  { %474 = vst.msk [vmem:[#allocation2] sm:$0xf] %vm473_vm0, %v1333_v18  ;;  %367 = vrot.lane.b32.xlu0 %v228_v43, %s1337_s8  ;;  %1217 = vmatprep.mubr.msk.f32.mxu0 %vm235_vm14, %v228_v43  ;;  %v838_v43 = vld [vmem:[%s1733_s16 + $0x8] sm:$0xff]  ;;  %v837_v44 = vld [vmem:[%s1733_s16] sm:$0xff] }
  0xa5   :  { %189 = vst.msk [vmem:[#allocation2 + $0x1a] sm:$0x3f] %vm177_vm9, %v185_v45  ;;  %v1147_v45 = vld [vmem:[%s1728_s11] ss:$0 sm:$0xff] }
  0xa6   :  { %482 = vst.msk [vmem:[#allocation2] sm:$0x3] %vm481_vm15, %v1333_v18  ;;  %v204_v46 = vpop.permute.xlu0 %203  ;;  %v206_v47 = vpop.permute.xlu1 %205  ;;  %v229_v48 = vld [vmem:[#allocation2 + $0x8] sm:$0xff] }
  0xa7   :  { %209 = vst.msk [vmem:[#allocation2 + $0x11] sm:$0xff] %vm198_vm11, %v204_v46  ;;  %369 = vrot.lane.b32.xlu1 %v229_v48, %s1337_s8  ;;  %1218 = vmatmul.mubr.msk.f32.vlgmr.msra.gmra.mxu0 %vm235_vm14, %v229_v48  ;;  %v713_v46 = vld [vmem:[%s1730_s13 + $0x28] sm:$0xff]  ;;  %v1148_v48 = vld [vmem:[%s1729_s12] ss:$0 sm:$0xff] }
  0xa8   :  { %210 = vst.msk [vmem:[#allocation2 + $0x19] sm:$0x7f] %vm200_vm12, %v206_v47  ;;  %1249 = vmatprep.subr.mxu0 %v713_v46  ;;  %vm954_vm12 = vcmask 261120  }
  0xa9   :  { %1250 = vmatpush3.msra.mxu0 %v713_v46 }
  0xaa   :  { %v221_v49 = vpop.permute.xlu0 %220  ;;  %v223_v50 = vpop.permute.xlu1 %222 }
  0xab   :  { %226 = vst.msk [vmem:[#allocation2 + $0x10] sm:$0xff] %vm217_vm13, %v221_v49  ;;  %227 = vst.msk [vmem:[#allocation2 + $0x18] sm:$0xff] %vm217_vm13, %v223_v50  ;;  %v712_v49 = vld [vmem:[%s1730_s13 + $0x20] sm:$0xff]  ;;  %vm1112_vm13 = vcmask 33792  }
  0xac   :  { %1251 = vmatprep.subr.mxu0 %v712_v49 }
  0xad   :  { %1252 = vmatpush3.msra.mxu0 %v712_v49 }
  0xb2   :  { %v230_v51 = vld [vmem:[#allocation2 + $0x10] sm:$0xff]  ;;  %v231_v52 = vld [vmem:[#allocation2 + $0x18] sm:$0xff] }
  0xb3   :  { %478 = vst.msk [vmem:[#allocation2 + $0x10] sm:$0xf] %vm473_vm0, %v1333_v18  ;;  %371 = vrot.lane.b32.xlu0 %v230_v51, %s1337_s8  ;;  %1220 = vmatprep.mubr.msk.f32.mxu0 %vm235_vm14, %v230_v51 }
  0xb4   :  { %495 = vst.msk [vmem:[#allocation2 + $0x10] sm:$0x3] %vm481_vm15, %v1333_v18  ;;  %373 = vrot.lane.b32.xlu1 %v231_v52, %s1337_s8  ;;  %1221 = vmatmul.mubr.msk.f32.gmra.mxu0 %vm235_vm14, %v231_v52  ;;  %v711_v52 = vld [vmem:[%s1730_s13 + $0x18] sm:$0xff] }
  0xb5   :  { %1253 = vmatprep.subr.mxu0 %v711_v52 }
  0xb6   :  { %1254 = vmatpush3.msra.mxu0 %v711_v52 }
 0x116   :  { %v368_v53 = vpop.permute.xlu0 %367 }
 0x117   :  { %1225 = vmatprep.mubr.msk.f32.mxu1 %vm375_vm1, %v368_v53  ;;  %v710_v53 = vld [vmem:[%s1730_s13 + $0x10] sm:$0xff] }
 0x118   :  { %1255 = vmatprep.subr.mxu0 %v710_v53 }
 0x119   :  { %v370_v54 = vpop.permute.xlu1 %369  ;;  %1256 = vmatpush3.msra.mxu0 %v710_v53 }
 0x11a   :  { %1226 = vmatmul.mubr.msk.f32.vlgmr.msra.gmra.mxu1 %vm375_vm1, %v370_v54 }
 0x11b   :  { %1232 = vmatpush3.msra.mxu1 %v532_v62 }
 0x11c   :  { %1233 = vmatprep.subr.mxu1 %v531_v0 }
 0x11d   :  { %1234 = vmatpush3.msra.mxu1 %v531_v0 }
 0x11e   :  { %1235 = vmatprep.subr.mxu1 %v530_v3 }
 0x11f   :  { %1236 = vmatpush3.msra.mxu1 %v530_v3 }
 0x120   :  { %1237 = vmatprep.subr.mxu1 %v529_v4 }
 0x121   :  { %1238 = vmatpush3.msra.mxu1 %v529_v4 }
 0x122   :  { %1239 = vmatprep.subr.mxu1 %v528_v7 }
 0x123   :  { %1240 = vmatpush3.msra.mxu1 %v528_v7 }
 0x124   :  { %1241 = vmatprep.subr.mxu1 %v527_v15 }
 0x125   :  { %v372_v55 = vpop.permute.xlu0 %371  ;;  %1242 = vmatpush3.msra.mxu1 %v527_v15 }
 0x126   :  { %v374_v56 = vpop.permute.xlu1 %373  ;;  %1228 = vmatprep.mubr.msk.f32.mxu1 %vm375_vm1, %v372_v55  ;;  %1267 = vmatprep.subr.mxu1 %v838_v43 }
 0x127   :  { %1229 = vmatmul.mubr.msk.f32.gmra.mxu1 %vm375_vm1, %v374_v56  ;;  %v709_v56 = vld [vmem:[%s1730_s13 + $0x8] sm:$0xff] }
 0x128   :  { %1257 = vmatprep.subr.mxu0 %v709_v56 }
 0x129   :  { %1258 = vmatpush3.msra.mxu0 %v709_v56 }
 0x167   :  { %v1219_v57 = vpop.f32.mrf.mxu0 }
 0x168   :  { %v341_v60 = vmul.f32 %v1219_v57, %v1136_v58 }
 0x169   :  { %v314_v59 = vpop.f32.mrf.mxu0 }
 0x16a   :  { %v340_v63 = vmul.f32 %v1136_v58, %v314_v59  ;;  %v352_v1 = vadd.f32 %v1137_v61, %v341_v60 }
 0x16c   :  { %v351_v5 = vadd.f32 %v1137_v61, %v340_v63  ;;  %v356_v8 = vmax.f32 %v352_v1, 0.0 }
 0x16e   :  { %v355_v12 = vmax.f32 %v351_v5, 0.0 }
 0x174   :  { %v1222_v9 = vpop.f32.mrf.mxu0 }
 0x175   :  { %v343_v19 = vmul.f32 %v1222_v9, %v1136_v58 }
 0x176   :  { %v324_v16 = vpop.f32.mrf.mxu0 }
 0x177   :  { %v342_v20 = vmul.f32 %v1136_v58, %v324_v16  ;;  %v354_v21 = vadd.f32 %v1137_v61, %v343_v19 }
 0x179   :  { %v353_v22 = vadd.f32 %v1137_v61, %v342_v20  ;;  %v358_v24 = vmax.f32 %v354_v21, 0.0  ;;  %v708_v61 = vld [vmem:[%s1730_s13] sm:$0xff] }
 0x17a   :  { %1259 = vmatprep.subr.mxu0 %v708_v61 }
 0x17b   :  { %v357_v27 = vmax.f32 %v353_v22, 0.0  ;;  %1260 = vmatpush3.msra.mxu0 %v708_v61  ;;  %v1031_v22 = vld [vmem:[%s1735_s18 + $0x18] sm:$0xff] }
 0x17c   :  { %1277 = vmatprep.subr.mxu0 %v1333_v18 }
 0x1da   :  { %v1227_v6 = vpop.f32.mrf.mxu1 }
 0x1db   :  { %v456_v10 = vadd.f32 %v1227_v6, %v1138_v2 }
 0x1dc   :  { %v450_v11 = vpop.f32.mrf.mxu1 }
 0x1dd   :  { %v1560_v13 = vadd.f32 %v456_v10, %v356_v8  ;;  %v451_v14 = vadd.f32 %v1138_v2, %v450_v11 }
 0x1df   :  { %477 = vst.msk [vmem:[#allocation2 + $0xc] sm:$0xf] %vm473_vm0, %v1560_v13  ;;  %v1567_v17 = vadd.f32 %v451_v14, %v355_v12  ;;  %487 = vrot.lane.b32.xlu1 %v1560_v13, %s1331_s22 }
 0x1e1   :  { %485 = vrot.lane.b32.xlu0 %v1567_v17, %s1331_s22  ;;  %476 = vst.msk [vmem:[#allocation2 + $0x4] sm:$0xff] %vm475_vm2, %v1567_v17 }
 0x1e3   :  { %508 = vrot.lane.b32.xlu1 %v1560_v13, %s1338_s10 }
 0x1e5   :  { %506 = vrot.lane.b32.xlu0 %v1567_v17, %s1338_s10 }
 0x1e7   :  { %v1230_v23 = vpop.f32.mrf.mxu1 }
 0x1e8   :  { %v466_v25 = vadd.f32 %v1230_v23, %v1138_v2  ;;  %v1030_v23 = vld [vmem:[%s1735_s18 + $0x10] sm:$0xff] }
 0x1e9   :  { %v460_v26 = vpop.f32.mrf.mxu1 }
 0x1ea   :  { %v1579_v28 = vadd.f32 %v466_v25, %v358_v24  ;;  %v461_v29 = vadd.f32 %v1138_v2, %v460_v26  ;;  %v1029_v24 = vld [vmem:[%s1735_s18 + $0x8] sm:$0xff]  ;;  %v943_v25 = vlaneseq }
 0x1ec   :  { %480 = vst.msk [vmem:[#allocation2 + $0x1c] sm:$0xf] %vm473_vm0, %v1579_v28  ;;  %v1583_v30 = vadd.f32 %v461_v29, %v357_v27  ;;  %500 = vrot.lane.b32.xlu1 %v1579_v28, %s1331_s22  ;;  %v1153_v29 = vld [vmem:[%s1731_s14] ss:$0 sm:$0xff] }
 0x1ee   :  { %498 = vrot.lane.b32.xlu0 %v1583_v30, %s1331_s22  ;;  %479 = vst.msk [vmem:[#allocation2 + $0x14] sm:$0xff] %vm475_vm2, %v1583_v30 }
 0x1f0   :  { %517 = vrot.lane.b32.xlu1 %v1579_v28, %s1338_s10 }
 0x1f2   :  { %515 = vrot.lane.b32.xlu0 %v1583_v30, %s1338_s10 }
 0x251   :  { %v488_v31 = vpop.permute.xlu1 %487 }
 0x252   :  { %494 = vst.msk [vmem:[#allocation2 + $0xa] sm:$0x3f] %vm493_vm3, %v488_v31 }
 0x253   :  { %v486_v32 = vpop.permute.xlu0 %485 }
 0x254   :  { %492 = vst.msk [vmem:[#allocation2 + $0x2] sm:$0xff] %vm491_vm4, %v486_v32 }
 0x255   :  { %v509_v33 = vpop.permute.xlu1 %508 }
 0x256   :  { %514 = vst.msk [vmem:[#allocation2 + $0x8] sm:$0xff] %vm512_vm5, %v509_v33 }
 0x257   :  { %v507_v34 = vpop.permute.xlu0 %506 }
 0x258   :  { %513 = vst.msk [vmem:[#allocation2] sm:$0xff] %vm512_vm5, %v507_v34 }
 0x25d   :  { %v524_v38 = vld [vmem:[#allocation2 + $0x8] sm:$0xff] }
 0x25e   :  { %v501_v35 = vpop.permute.xlu1 %500 }
 0x25f   :  { %505 = vst.msk [vmem:[#allocation2 + $0x1a] sm:$0x3f] %vm493_vm3, %v501_v35  ;;  %v523_v36 = vld [vmem:[#allocation2] sm:$0xff] }
 0x260   :  { %1243 = vmatprep.mubr.msk.f32.mxu1 %vm533_vm6, %v523_v36  ;;  %661 = vst.msk [vmem:[#allocation2] sm:$0xff] %vm475_vm2, %v1333_v18  ;;  %v499_v37 = vpop.permute.xlu0 %498  ;;  %v1154_v35 = vld [vmem:[%s1750_s2] ss:$0 sm:$0xff] }
 0x261   :  { %504 = vst.msk [vmem:[#allocation2 + $0x12] sm:$0xff] %vm491_vm4, %v499_v37  ;;  %1244 = vmatmul.mubr.msk.f32.vlgmr.msra.gmra.mxu1 %vm533_vm6, %v524_v38 }
 0x262   :  { %v518_v39 = vpop.permute.xlu1 %517  ;;  %1268 = vmatpush3.msra.mxu1 %v838_v43  ;;  %666 = vst.msk [vmem:[#allocation2] sm:$0xf] %vm665_vm7, %v1333_v18 }
 0x263   :  { %522 = vst.msk [vmem:[#allocation2 + $0x18] sm:$0xff] %vm512_vm5, %v518_v39  ;;  %1269 = vmatprep.subr.mxu1 %v837_v44 }
 0x264   :  { %v516_v40 = vpop.permute.xlu0 %515  ;;  %1270 = vmatpush3.msra.mxu1 %v837_v44 }
 0x265   :  { %521 = vst.msk [vmem:[#allocation2 + $0x10] sm:$0xff] %vm512_vm5, %v516_v40  ;;  %1288 = vmatprep.subr.mxu1 %v1333_v18  ;;  %v946_v40 = vand.u32 127, %v943_v25 }
 0x26a   :  { %v526_v42 = vld [vmem:[#allocation2 + $0x18] sm:$0xff] }
 0x26c   :  { %v525_v41 = vld [vmem:[#allocation2 + $0x10] sm:$0xff] }
 0x26d   :  { %1246 = vmatprep.mubr.msk.f32.mxu1 %vm533_vm6, %v525_v41  ;;  %663 = vst.msk [vmem:[#allocation2 + $0x10] sm:$0xff] %vm475_vm2, %v1333_v18 }
 0x26e   :  { %1247 = vmatmul.mubr.msk.f32.gmra.mxu1 %vm533_vm6, %v526_v42  ;;  %677 = vst.msk [vmem:[#allocation2 + $0x10] sm:$0xf] %vm665_vm7, %v1333_v18 }
 0x321   :  { %v1245_v47 = vpop.f32.mrf.mxu1 }
 0x322   :  { %v639_v50 = vmul.f32 %v1245_v47, %v1147_v45  ;;  %v1155_v47 = vld [vmem:[%s1734_s17] ss:$0 sm:$0xff] }
 0x323   :  { %v612_v51 = vpop.f32.mrf.mxu1 }
 0x324   :  { %v650_v54 = vadd.f32 %v1148_v48, %v639_v50  ;;  %v638_v55 = vmul.f32 %v1147_v45, %v612_v51 }
 0x326   :  { %v654_v57 = vmax.f32 %v650_v54, 0.0  ;;  %v649_v58 = vadd.f32 %v1148_v48, %v638_v55 }
 0x328   :  { %v653_v59 = vmax.f32 %v649_v58, 0.0  ;;  %v658_v60 = vadd.f32 %v654_v57, %v1560_v13 }
 0x32a   :  { %v657_v62 = vadd.f32 %v653_v59, %v1567_v17  ;;  %671 = vrot.lane.b32.xlu1 %v658_v60, %s1331_s22 }
 0x32c   :  { %662 = vst.msk [vmem:[#allocation2 + $0x8] sm:$0xff] %vm475_vm2, %v657_v62  ;;  %669 = vrot.lane.b32.xlu0 %v657_v62, %s1331_s22  ;;  %1271 = vmatprep.mubr.msk.f32.mxu1 %vm475_vm2, %v657_v62 }
 0x32d   :  { %1272 = vmatmul.mubr.msk.f32.vlgmr.msra.gmra.mxu1 %vm475_vm2, %v658_v60 }
 0x32e   :  { %690 = vrot.lane.b32.xlu1 %v658_v60, %s1338_s10  ;;  %v1248_v63 = vpop.f32.mrf.mxu1  ;;  %1289 = vmatpush3.msra.mxu1 %v1031_v22 }
 0x32f   :  { %v641_v0 = vmul.f32 %v1248_v63, %v1147_v45  ;;  %1290 = vmatprep.subr.mxu1 %v1333_v18 }
 0x330   :  { %688 = vrot.lane.b32.xlu0 %v657_v62, %s1338_s10  ;;  %v622_v1 = vpop.f32.mrf.mxu1  ;;  %1291 = vmatpush3.msra.mxu1 %v1030_v23 }
 0x331   :  { %v652_v2 = vadd.f32 %v1148_v48, %v641_v0  ;;  %v640_v3 = vmul.f32 %v1147_v45, %v622_v1  ;;  %1292 = vmatprep.subr.mxu1 %v1333_v18  ;;  %v1028_v0 = vld [vmem:[%s1735_s18] sm:$0xff] }
 0x332   :  { %1293 = vmatpush3.msra.mxu1 %v1029_v24 }
 0x333   :  { %v656_v4 = vmax.f32 %v652_v2, 0.0  ;;  %v651_v5 = vadd.f32 %v1148_v48, %v640_v3  ;;  %1294 = vmatprep.subr.mxu1 %v1333_v18  ;;  %v1161_v3 = vld [vmem:[%s1736_s19] ss:$0 sm:$0xff] }
 0x334   :  { %1295 = vmatpush3.msra.mxu1 %v1028_v0 }
 0x335   :  { %v655_v6 = vmax.f32 %v651_v5, 0.0  ;;  %v660_v7 = vadd.f32 %v656_v4, %v1579_v28  ;;  %v944_v28 = vshrl.u32 %v943_v25, 7 }
 0x337   :  { %v659_v8 = vadd.f32 %v655_v6, %v1583_v30  ;;  %682 = vrot.lane.b32.xlu1 %v660_v7, %s1331_s22  ;;  %v949_v34 = vadd.s32 1, %v944_v28  ;;  %v947_v41 = vmul.u32 16, %v944_v28 }
 0x339   :  { %664 = vst.msk [vmem:[#allocation2 + $0x18] sm:$0xff] %vm475_vm2, %v659_v8  ;;  %680 = vrot.lane.b32.xlu0 %v659_v8, %s1331_s22  ;;  %1274 = vmatprep.mubr.msk.f32.mxu1 %vm475_vm2, %v659_v8  ;;  %v950_v46 = vmul.u32 16, %v949_v34  ;;  %vm1698_vm9 = vcmp.ge.s32.totalorder %v946_v40, %v947_v41 }
 0x33a   :  { %1275 = vmatmul.mubr.msk.f32.gmra.mxu1 %vm475_vm2, %v660_v7 }
 0x33b   :  { %698 = vrot.lane.b32.xlu1 %v660_v7, %s1338_s10  ;;  %1296 = vmatprep.mubr.msk.f32.mxu1 %vm1339_vm8, %v1333_v18  ;;  %vm951_vm10 = vcmp.lt.s32.totalorder %v946_v40, %v950_v46 }
 0x33c   :  { %vm952_vm11 = vmand %vm1698_vm9, %vm951_vm10 }
 0x33d   :  { %696 = vrot.lane.b32.xlu0 %v659_v8, %s1338_s10  ;;  %v953_v63 = vsel %vm952_vm11, 0.0625, %v1333_v18 }
 0x39c   :  { %v672_v9 = vpop.permute.xlu1 %671 }
 0x39d   :  { %676 = vst.msk [vmem:[#allocation2 + $0xc] sm:$0xf] %vm665_vm7, %v672_v9 }
 0x39e   :  { %v670_v10 = vpop.permute.xlu0 %669 }
 0x39f   :  { %675 = vst.msk [vmem:[#allocation2 + $0x4] sm:$0xff] %vm491_vm4, %v670_v10 }
 0x3a0   :  { %v691_v11 = vpop.permute.xlu1 %690 }
 0x3a1   :  { %695 = vst.msk [vmem:[#allocation2 + $0x8] sm:$0xff] %vm512_vm5, %v691_v11 }
 0x3a2   :  { %v689_v12 = vpop.permute.xlu0 %688 }
 0x3a3   :  { %694 = vst.msk [vmem:[#allocation2] sm:$0xff] %vm512_vm5, %v689_v12 }
 0x3a8   :  { %v705_v16 = vld [vmem:[#allocation2 + $0x8] sm:$0xff] }
 0x3a9   :  { %v683_v13 = vpop.permute.xlu1 %682 }
 0x3aa   :  { %687 = vst.msk [vmem:[#allocation2 + $0x1c] sm:$0xf] %vm665_vm7, %v683_v13  ;;  %v704_v14 = vld [vmem:[#allocation2] sm:$0xff] }
 0x3ab   :  { %1261 = vmatprep.mubr.msk.f32.mxu0 %vm533_vm6, %v704_v14  ;;  %v681_v15 = vpop.permute.xlu0 %680 }
 0x3ac   :  { %686 = vst.msk [vmem:[#allocation2 + $0x14] sm:$0xff] %vm491_vm4, %v681_v15  ;;  %1262 = vmatmul.mubr.msk.f32.vlgmr.msra.gmra.mxu0 %vm533_vm6, %v705_v16 }
 0x3ad   :  { %v699_v17 = vpop.permute.xlu1 %698 }
 0x3ae   :  { %703 = vst.msk [vmem:[#allocation2 + $0x18] sm:$0xff] %vm512_vm5, %v699_v17 }
 0x3af   :  { %v697_v19 = vpop.permute.xlu0 %696 }
 0x3b0   :  { %702 = vst.msk [vmem:[#allocation2 + $0x10] sm:$0xff] %vm512_vm5, %v697_v19 }
 0x3b5   :  { %v707_v21 = vld [vmem:[#allocation2 + $0x18] sm:$0xff] }
 0x3b7   :  { %v706_v20 = vld [vmem:[#allocation2 + $0x10] sm:$0xff] }
 0x3b8   :  { %1264 = vmatprep.mubr.msk.f32.mxu0 %vm533_vm6, %v706_v20 }
 0x3b9   :  { %1265 = vmatmul.mubr.msk.f32.gmra.mxu0 %vm533_vm6, %v707_v21 }
 0x3ba   :  { %1285 = vmatprep.mubr.msk.f32.mxu0 %vm1339_vm8, %v1333_v18 }
 0x3ed   :  { %v1273_v26 = vpop.f32.mrf.mxu1 }
 0x3ee   :  { %v926_v57 = vadd.f32 %v1273_v26, %v1155_v47 }
 0x3ef   :  { %v920_v30 = vpop.f32.mrf.mxu1 }
 0x3f0   :  { %v921_v60 = vadd.f32 %v1155_v47, %v920_v30 }
 0x3fa   :  { %v1276_v32 = vpop.f32.mrf.mxu1 }
 0x3fb   :  { %v936_v48 = vadd.f32 %v1276_v32, %v1155_v47 }
 0x3fc   :  { %v930_v42 = vpop.f32.mrf.mxu1 }
 0x3fd   :  { %v931_v52 = vadd.f32 %v1155_v47, %v930_v42 }
 0x46c   :  { %v1263_v27 = vpop.f32.mrf.mxu0 }
 0x46d   :  { %v819_v33 = vmul.f32 %v1263_v27, %v1153_v29 }
 0x46e   :  { %v792_v31 = vpop.f32.mrf.mxu0 }
 0x46f   :  { %v818_v37 = vmul.f32 %v1153_v29, %v792_v31  ;;  %v830_v43 = vadd.f32 %v1154_v35, %v819_v33 }
 0x471   :  { %v829_v49 = vadd.f32 %v1154_v35, %v818_v37  ;;  %v834_v54 = vmax.f32 %v830_v43, 0.0 }
 0x473   :  { %v833_v58 = vmax.f32 %v829_v49, 0.0  ;;  %v940_v61 = vadd.f32 %v926_v57, %v834_v54 }
 0x475   :  { %v939_v62 = vadd.f32 %v921_v60, %v833_v58 }
 0x479   :  { %v1266_v36 = vpop.f32.mrf.mxu0 }
 0x47a   :  { %v821_v38 = vmul.f32 %v1266_v36, %v1153_v29 }
 0x47b   :  { %v802_v39 = vpop.f32.mrf.mxu0 }
 0x47c   :  { %v832_v44 = vadd.f32 %v1154_v35, %v821_v38  ;;  %v820_v45 = vmul.f32 %v1153_v29, %v802_v39 }
 0x47e   :  { %v836_v50 = vmax.f32 %v832_v44, 0.0  ;;  %v831_v51 = vadd.f32 %v1154_v35, %v820_v45 }
 0x480   :  { %v942_v55 = vadd.f32 %v936_v48, %v836_v50  ;;  %v835_v56 = vmax.f32 %v831_v51, 0.0 }
 0x482   :  { %v941_v59 = vadd.f32 %v931_v52, %v835_v56  ;;  %1278 = vmatpush3.msra.mxu0 %v942_v55 }
 0x483   :  { %1279 = vmatprep.subr.mxu0 %v1333_v18 }
 0x484   :  { %1280 = vmatpush3.msra.mxu0 %v941_v59 }
 0x485   :  { %1281 = vmatprep.subr.mxu0 %v1333_v18 }
 0x486   :  { %1282 = vmatpush3.msra.mxu0 %v940_v61 }
 0x487   :  { %1283 = vmatprep.subr.mxu0 %v1333_v18 }
 0x488   :  { %1284 = vmatpush3.msra.mxu0 %v939_v62 }
 0x489   :  { %1286 = vmatmul.mubr.msk.f32.vlgmr.msra.gmra.mxu0 %vm954_vm12, %v953_v63 }
 0x549   :  { %v1024_v1 = vpop.f32.mrf.mxu0 }
 0x54a   :  { %1297 = vmatmul.mubr.msk.f32.vlgmr.msra.gmra.mxu1 %vm954_vm12, %v1024_v1 }
 0x54b   :  { %v1287_v2 = vpop.f32.mrf.mxu0 }
 0x60a   :  { %v1108_v4 = vpop.f32.mrf.mxu1 }
 0x60b   :  { %v1109_v5 = vadd.f32 %v1161_v3, %v1108_v4 }
 0x60c   :  { %v1298_v18 = vpop.f32.mrf.mxu1 }
 0x60d   :  { %1113 = vst.msk [vmem:[#allocation3] sm:$0x3] %vm1112_vm13, %v1109_v5 }
 0x60e   :  { %1320 = shalt.err (!%p1317_p4)
}
 0x60f   :  { %1123 = dma.vmem_to_hbm [thread:$0]  %s1121_s27, 32, %s1737_s20, [#allocation4]  }
 0x610   :  { %1329 = dma.done.wait [#allocation4], 32  }
 0x611   :  { %1330 = vsyncadd [#allocation4], 4294967264 }
 0x612   :  { %1127 = vsyncpa [#allocation4], 1 }

</bundles_post_ra>
